<compile_context>
chip_gen: v7x
topology: tpu7x:2x2x1
jax: 0.10.0
libtpu: 0.0.40
codegen_flags: <defaults>
</compile_context>

<pallas_src>
import jax
import jax.numpy as jnp
from jax import lax
from jax.experimental import pallas as pl
from jax.experimental.pallas import tpu as pltpu

LN_EPS = 1e-5


def _make_kernel(c2, npk):
    """Build the fused LayerNorm + reduction kernel.

    c2  : 2*dim (per-token output channels).
    npk : merged tokens packed per lane row (1, or 2 when 2*dim < 128).
    """
    lanes = npk * c2
    inv_4c = 1.0 / float(2 * c2)      # LayerNorm is over 4*dim = 2*c2 channels

    def kernel(x_ref, wev_ref, wod_ref, bias_ref, o_ref):
        # x_ref   : (tp, 2, wp, lanes)  -- tp row-pairs; axis 1 = image-row parity
        # wev_ref : (lanes, lanes) bf16 -- gamma-folded rows for [x0|x2] (block-diag if npk>1)
        # wod_ref : (lanes, lanes) bf16 -- gamma-folded rows for [x1|x3]
        # bias_ref: (1, lanes) f32      -- beta @ W (tiled if npk>1)
        # o_ref   : (tp, wp, lanes)
        tp, _, wp, _ = x_ref.shape
        m = tp * wp

        blk = x_ref[...]
        ev = blk[:, 0].astype(jnp.float32)      # per token: [x0 | x2]  (x npk)
        od = blk[:, 1].astype(jnp.float32)      # per token: [x1 | x3]  (x npk)

        # LayerNorm statistics in f32, two-pass (centered) variance.
        # Tail (cdiv-padded) rows may contain garbage; they are row-independent,
        # clamped non-negative, and discarded when the block is stored.
        s = ev + od
        if npk == 1:
            mean = jnp.sum(s, axis=-1, keepdims=True) * inv_4c
            dev_ev = ev - mean
            dev_od = od - mean
            d2 = dev_ev * dev_ev + dev_od * dev_od
            var = jnp.maximum(jnp.sum(d2, axis=-1, keepdims=True) * inv_4c, 0.0)
            inv_std = lax.rsqrt(var + LN_EPS)
        else:
            # Two merged tokens share one lane row: per-2C-chunk stats via masks.
            lane = lax.broadcasted_iota(jnp.int32, (1, 1, lanes), 2)
            first = lane < c2
            s_lo = jnp.sum(jnp.where(first, s, 0.0), axis=-1, keepdims=True)
            s_hi = jnp.sum(s, axis=-1, keepdims=True) - s_lo
            mean = jnp.where(first, s_lo, s_hi) * inv_4c
            dev_ev = ev - mean
            dev_od = od - mean
            d2 = dev_ev * dev_ev + dev_od * dev_od
            d_lo = jnp.sum(jnp.where(first, d2, 0.0), axis=-1, keepdims=True)
            d_hi = jnp.sum(d2, axis=-1, keepdims=True) - d_lo
            inv_lo = lax.rsqrt(jnp.maximum(d_lo * inv_4c, 0.0) + LN_EPS)
            inv_hi = lax.rsqrt(jnp.maximum(d_hi * inv_4c, 0.0) + LN_EPS)
            inv_std = jnp.where(first, inv_lo, inv_hi)

        # Rank-2 view for the MXU (a no-op relayout when wp % 8 == 0).
        xn_ev = (dev_ev * inv_std).astype(jnp.bfloat16).reshape(m, lanes)
        xn_od = (dev_od * inv_std).astype(jnp.bfloat16).reshape(m, lanes)

        acc = jnp.dot(xn_ev, wev_ref[...], preferred_element_type=jnp.float32)
        acc = acc + jnp.dot(xn_od, wod_ref[...], preferred_element_type=jnp.float32)
        acc = acc + bias_ref[...]
        o_ref[...] = acc.reshape(tp, wp, lanes).astype(o_ref.dtype)

    return kernel


def _vmem_plan():
    """Generation-aware (vmem_limit_bytes, block_budget_bytes, multi_core)."""
    try:
        cap = int(pltpu.get_tpu_info().vmem_capacity_bytes)
    except Exception:
        cap = 64 * 1024 * 1024          # conservative (v7x-class per-core VMEM)
    if cap >= 100 * 1024 * 1024:
        # v5e / v6e class: 128 MiB VMEM, single TensorCore per chip.
        return 64 * 1024 * 1024, 40 * 1024 * 1024, False
    # v7x class: 64 MiB VMEM per core, two TensorCores share the grid.
    limit = min(48 * 1024 * 1024, (cap * 3) // 4)
    return limit, min(26 * 1024 * 1024, limit // 2), True


def _pick_row_pair_tile(p, wp, lanes, in_bytes, out_bytes, budget, multi_core):
    """How many (even, odd) image-row pairs each grid step processes."""
    wp_pad = -(-wp // 8) * 8   # sublane padding of each (wp, lanes) slab in VMEM
    # Per row-pair VMEM: double-buffered input (2 parity slabs) + double-buffered
    # output slab + ~32 B per output element of in-kernel f32/bf16 temporaries
    # (ev/od, deviations, squares, xn, acc, LN stats).
    per_pair = wp_pad * lanes * (4 * in_bytes + 2 * out_bytes + 32)
    tp_max = max(1, min(p, budget // per_pair))
    steps = -(-p // tp_max)
    if multi_core and p > 1:
        # Keep both v7x TensorCores busy and the realized step count even.
        steps = max(steps, 2)
        if steps % 2:
            steps += 1
    tp = -(-p // steps)
    if multi_core and p > 1 and (-(-p // tp)) % 2:
        for cand in range(tp, max(tp - 8, 0), -1):
            if (-(-p // cand)) % 2 == 0:
                tp = cand
                break
    return int(tp)


def patch_merging_forward(x, input_resolution, gamma, beta, w_t):
    """Fused PatchMerging forward.

    x     : (B, H*W, C) channels-last tokens (f32 or bf16; bf16 halves HBM traffic).
    gamma, beta : (4C,) LayerNorm affine parameters.
    w_t   : (4C, 2C) = transposed torch nn.Linear(4C, 2C, bias=False) weight.
    Returns (B, H*W/4, 2C) in x.dtype.
    """
    h, w = input_resolution
    b, seq_len, c = x.shape
    assert seq_len == h * w, "input feature has wrong size"
    assert h % 2 == 0 and w % 2 == 0, f"x size ({h}*{w}) are not even."
    c2 = 2 * c
    w2 = w // 2
    p = b * (h // 2)                 # number of (even, odd) image-row pairs

    # Lane packing: when 2C < 128, pack two adjacent merged tokens per lane row
    # so VMEM tiles and output writebacks are lane-dense (unmasked vst).
    npk = 2 if (c2 < 128 and w2 % 2 == 0) else 1
    wp = w2 // npk
    lanes = npk * c2

    # Free, layout-preserving view: (B, H*W, C) -> (p, 2, wp, lanes).
    # xv[q, 0, j, :] holds the [x0 | x2] channels of npk adjacent merged tokens,
    # xv[q, 1, j, :] the [x1 | x3] channels.
    xv = x.reshape(p, 2, wp, lanes)

    # Fold LayerNorm affine into the reduction weight; reorder rows so the
    # kernel's natural channel order [x0, x2 | x1, x3] reproduces torch's
    # [x0, x1, x2, x3] ordering.
    gw = gamma.astype(jnp.float32)[:, None] * w_t.astype(jnp.float32)
    w_ev = jnp.concatenate([gw[0:c], gw[2 * c:3 * c]], axis=0)      # (2C, 2C)
    w_od = jnp.concatenate([gw[c:2 * c], gw[3 * c:4 * c]], axis=0)  # (2C, 2C)
    bias = (beta.astype(jnp.float32) @ w_t.astype(jnp.float32)).reshape(1, c2)
    if npk == 2:
        z = jnp.zeros((c2, c2), jnp.float32)
        w_ev = jnp.block([[w_ev, z], [z, w_ev]])                    # block-diagonal
        w_od = jnp.block([[w_od, z], [z, w_od]])
        bias = jnp.tile(bias, (1, npk))
    w_ev = w_ev.astype(jnp.bfloat16)
    w_od = w_od.astype(jnp.bfloat16)

    out_dtype = x.dtype
    in_bytes = jnp.dtype(x.dtype).itemsize
    out_bytes = jnp.dtype(out_dtype).itemsize

    vmem_limit, budget, multi_core = _vmem_plan()
    # Weights are double-buffered by the pipeline; reserve them plus slack.
    # (pl.Buffered(1) on the constant-index weight specs would reclaim half of
    #  this; skipped as minor polish since weights are tiny vs the block budget.)
    budget = max(2 * 1024 * 1024, budget - 8 * lanes * lanes - 1024 * 1024)
    tp = _pick_row_pair_tile(p, wp, lanes, in_bytes, out_bytes, budget, multi_core)
    grid = (-(-p // tp),)

    out = pl.pallas_call(
        _make_kernel(c2, npk),
        out_shape=jax.ShapeDtypeStruct((p, wp, lanes), out_dtype),
        grid_spec=pltpu.PrefetchScalarGridSpec(
            num_scalar_prefetch=0,
            grid=grid,
            in_specs=[
                pl.BlockSpec((tp, 2, wp, lanes), lambda q: (q, 0, 0, 0)),
                pl.BlockSpec((lanes, lanes), lambda q: (0, 0)),
                pl.BlockSpec((lanes, lanes), lambda q: (0, 0)),
                pl.BlockSpec((1, lanes), lambda q: (0, 0)),
            ],
            out_specs=pl.BlockSpec((tp, wp, lanes), lambda q: (q, 0, 0)),
        ),
        compiler_params=pltpu.CompilerParams(
            dimension_semantics=("parallel",),
            vmem_limit_bytes=vmem_limit,
        ),
    )(xv, w_ev, w_od, bias)

    # (p, wp, lanes) is (b, h/2, w/2/npk, npk, 2C) row-major -> free reshape.
    return out.reshape(b, (h // 2) * (w // 2), c2)


def _reference(x, input_resolution, gamma, beta, w_t):
    h, w = input_resolution
    b, _, c = x.shape
    xr = x.reshape(b, h, w, c).astype(jnp.float32)
    xm = jnp.concatenate(
        [xr[:, 0::2, 0::2, :], xr[:, 1::2, 0::2, :],
         xr[:, 0::2, 1::2, :], xr[:, 1::2, 1::2, :]], axis=-1)
    xm = xm.reshape(b, -1, 4 * c)
    mean = jnp.mean(xm, axis=-1, keepdims=True)
    var = jnp.mean((xm - mean) ** 2, axis=-1, keepdims=True)
    xn = (xm - mean) / jnp.sqrt(var + LN_EPS) * gamma + beta
    return xn @ w_t.astype(jnp.float32)


if __name__ == "__main__":
    key = jax.random.PRNGKey(0)
    k_x, k_w, k_g, k_b, k_x2, k_w2, k_g2, k_b2 = jax.random.split(key, 8)

    # Case 1 (shipped config): C=32 -> 2C=64 < 128 exercises the lane-packed path.
    B, H, W, C = 2, 16, 16, 32
    x = jax.random.normal(k_x, (B, H * W, C), dtype=jnp.float32)
    # torch Linear(4C, 2C, bias=False) weight has shape (2C, 4C); pass W^T.
    w_torch = 0.02 * jax.random.normal(k_w, (2 * C, 4 * C), dtype=jnp.float32)
    w_t = jnp.transpose(w_torch)                         # (4C, 2C)
    gamma = 1.0 + 0.1 * jax.random.normal(k_g, (4 * C,), dtype=jnp.float32)
    beta = 0.1 * jax.random.normal(k_b, (4 * C,), dtype=jnp.float32)

    out = jax.block_until_ready(patch_merging_forward(x, (H, W), gamma, beta, w_t))
    assert out.shape == (B, (H // 2) * (W // 2), 2 * C)
    ref = _reference(x, (H, W), gamma, beta, w_t)
    err = float(jnp.max(jnp.abs(out.astype(jnp.float32) - ref)))
    assert err < 2e-2, f"case1 max abs err {err}"        # bf16 MXU vs f32 reference

    # Case 2: 2C >= 128 exercises the general (unpacked, lane-dense) path.
    B2, H2, W2, C2 = 1, 8, 8, 64
    x2 = jax.random.normal(k_x2, (B2, H2 * W2, C2), dtype=jnp.float32)
    wt2 = jnp.transpose(0.02 * jax.random.normal(k_w2, (2 * C2, 4 * C2), jnp.float32))
    g2 = 1.0 + 0.1 * jax.random.normal(k_g2, (4 * C2,), jnp.float32)
    b2 = 0.1 * jax.random.normal(k_b2, (4 * C2,), jnp.float32)
    out2 = jax.block_until_ready(patch_merging_forward(x2, (H2, W2), g2, b2, wt2))
    ref2 = _reference(x2, (H2, W2), g2, b2, wt2)
    err2 = float(jnp.max(jnp.abs(out2.astype(jnp.float32) - ref2)))
    assert err2 < 2e-2, f"case2 max abs err {err2}"

    print("KERNEL_OK")
</pallas_src>

<mosaic_0001>
module attributes {stable_mosaic.version = 11 : i64} {
  func.func @kernel(%arg0: i32, %arg1: memref<8x2x4x128xf32, #tpu.memory_space<vmem>>, %arg2: memref<128x128xbf16, #tpu.memory_space<vmem>>, %arg3: memref<128x128xbf16, #tpu.memory_space<vmem>>, %arg4: memref<1x128xf32, #tpu.memory_space<vmem>>, %arg5: memref<8x4x128xf32, #tpu.memory_space<vmem>>) attributes {dimension_semantics = [#tpu.dimension_semantics<parallel>], iteration_bounds = array<i64: 2>, scalar_prefetch = 0 : i64, scratch_operands = 0 : i64, tpu.core_type = #tpu.core_type<tc>, window_params = [{transform_indices = @transform_0, window_bounds = array<i64: 8, 2, 4, 128>}, {pipeline_mode = #tpu.pipeline_mode<synchronous>, transform_indices = @transform_1, window_bounds = array<i64: 128, 128>}, {pipeline_mode = #tpu.pipeline_mode<synchronous>, transform_indices = @transform_2, window_bounds = array<i64: 128, 128>}, {pipeline_mode = #tpu.pipeline_mode<synchronous>, transform_indices = @transform_3, window_bounds = array<i64: 1, 128>}, {transform_indices = @transform_4, window_bounds = array<i64: 8, 4, 128>}]} {
    %c0 = arith.constant 0 : index
    %c0_0 = arith.constant 0 : index
    %c0_1 = arith.constant 0 : index
    %c0_2 = arith.constant 0 : index
    %0 = vector.load %arg1[%c0, %c0_0, %c0_1, %c0_2] : memref<8x2x4x128xf32, #tpu.memory_space<vmem>>, vector<8x2x4x128xf32>
    %1 = vector.extract_strided_slice %0 {offsets = [0, 0, 0, 0], sizes = [8, 1, 4, 128], strides = [1, 1, 1, 1]} : vector<8x2x4x128xf32> to vector<8x1x4x128xf32>
    %2 = vector.shape_cast %1 : vector<8x1x4x128xf32> to vector<8x4x128xf32>
    %3 = vector.extract_strided_slice %0 {offsets = [0, 1, 0, 0], sizes = [8, 1, 4, 128], strides = [1, 1, 1, 1]} : vector<8x2x4x128xf32> to vector<8x1x4x128xf32>
    %4 = vector.shape_cast %3 : vector<8x1x4x128xf32> to vector<8x4x128xf32>
    %5 = arith.addf %2, %4 : vector<8x4x128xf32>
    %6 = tpu.iota {dimensions = array<i32: 2>} : vector<1x1x128xi32>
    %c64_i32 = arith.constant 64 : i32
    %7 = vector.broadcast %c64_i32 : i32 to vector<1x1x128xi32>
    %8 = arith.cmpi slt, %6, %7 : vector<1x1x128xi32>
    %cst = arith.constant 0.000000e+00 : f32
    %9 = vector.shape_cast %8 : vector<1x1x128xi1> to vector<1x1x128xi1>
    %10 = vector.broadcast %9 : vector<1x1x128xi1> to vector<8x4x128xi1>
    %11 = vector.broadcast %cst : f32 to vector<8x4x128xf32>
    %12 = arith.select %10, %5, %11 : vector<8x4x128xi1>, vector<8x4x128xf32>
    %cst_3 = arith.constant dense<0.000000e+00> : vector<8x4xf32>
    %13 = vector.multi_reduction <add>, %12, %cst_3 [2] : vector<8x4x128xf32> to vector<8x4xf32>
    %14 = vector.shape_cast %13 : vector<8x4xf32> to vector<8x4x1xf32>
    %cst_4 = arith.constant dense<0.000000e+00> : vector<8x4xf32>
    %15 = vector.multi_reduction <add>, %5, %cst_4 [2] : vector<8x4x128xf32> to vector<8x4xf32>
    %16 = vector.shape_cast %15 : vector<8x4xf32> to vector<8x4x1xf32>
    %17 = arith.subf %16, %14 : vector<8x4x1xf32>
    %18 = vector.shape_cast %8 : vector<1x1x128xi1> to vector<1x1x128xi1>
    %19 = vector.broadcast %18 : vector<1x1x128xi1> to vector<8x4x128xi1>
    %20 = vector.shape_cast %14 : vector<8x4x1xf32> to vector<8x4x1xf32>
    %21 = vector.broadcast %20 : vector<8x4x1xf32> to vector<8x4x128xf32>
    %22 = vector.shape_cast %17 : vector<8x4x1xf32> to vector<8x4x1xf32>
    %23 = vector.broadcast %22 : vector<8x4x1xf32> to vector<8x4x128xf32>
    %24 = arith.select %19, %21, %23 : vector<8x4x128xi1>, vector<8x4x128xf32>
    %cst_5 = arith.constant 7.812500e-03 : f32
    %25 = vector.broadcast %cst_5 : f32 to vector<8x4x128xf32>
    %26 = arith.mulf %24, %25 : vector<8x4x128xf32>
    %27 = arith.subf %2, %26 : vector<8x4x128xf32>
    %28 = arith.subf %4, %26 : vector<8x4x128xf32>
    %29 = arith.mulf %27, %27 : vector<8x4x128xf32>
    %30 = arith.mulf %28, %28 : vector<8x4x128xf32>
    %31 = arith.addf %29, %30 : vector<8x4x128xf32>
    %cst_6 = arith.constant 0.000000e+00 : f32
    %32 = vector.shape_cast %8 : vector<1x1x128xi1> to vector<1x1x128xi1>
    %33 = vector.broadcast %32 : vector<1x1x128xi1> to vector<8x4x128xi1>
    %34 = vector.broadcast %cst_6 : f32 to vector<8x4x128xf32>
    %35 = arith.select %33, %31, %34 : vector<8x4x128xi1>, vector<8x4x128xf32>
    %cst_7 = arith.constant dense<0.000000e+00> : vector<8x4xf32>
    %36 = vector.multi_reduction <add>, %35, %cst_7 [2] : vector<8x4x128xf32> to vector<8x4xf32>
    %37 = vector.shape_cast %36 : vector<8x4xf32> to vector<8x4x1xf32>
    %cst_8 = arith.constant dense<0.000000e+00> : vector<8x4xf32>
    %38 = vector.multi_reduction <add>, %31, %cst_8 [2] : vector<8x4x128xf32> to vector<8x4xf32>
    %39 = vector.shape_cast %38 : vector<8x4xf32> to vector<8x4x1xf32>
    %40 = arith.subf %39, %37 : vector<8x4x1xf32>
    %cst_9 = arith.constant 7.812500e-03 : f32
    %41 = vector.broadcast %cst_9 : f32 to vector<8x4x1xf32>
    %42 = arith.mulf %37, %41 : vector<8x4x1xf32>
    %cst_10 = arith.constant 0.000000e+00 : f32
    %43 = vector.broadcast %cst_10 : f32 to vector<8x4x1xf32>
    %44 = arith.maximumf %42, %43 : vector<8x4x1xf32>
    %cst_11 = arith.constant 9.99999974E-6 : f32
    %45 = vector.broadcast %cst_11 : f32 to vector<8x4x1xf32>
    %46 = arith.addf %44, %45 : vector<8x4x1xf32>
    %47 = math.rsqrt %46 : vector<8x4x1xf32>
    %cst_12 = arith.constant 7.812500e-03 : f32
    %48 = vector.broadcast %cst_12 : f32 to vector<8x4x1xf32>
    %49 = arith.mulf %40, %48 : vector<8x4x1xf32>
    %cst_13 = arith.constant 0.000000e+00 : f32
    %50 = vector.broadcast %cst_13 : f32 to vector<8x4x1xf32>
    %51 = arith.maximumf %49, %50 : vector<8x4x1xf32>
    %cst_14 = arith.constant 9.99999974E-6 : f32
    %52 = vector.broadcast %cst_14 : f32 to vector<8x4x1xf32>
    %53 = arith.addf %51, %52 : vector<8x4x1xf32>
    %54 = math.rsqrt %53 : vector<8x4x1xf32>
    %55 = vector.shape_cast %8 : vector<1x1x128xi1> to vector<1x1x128xi1>
    %56 = vector.broadcast %55 : vector<1x1x128xi1> to vector<8x4x128xi1>
    %57 = vector.shape_cast %47 : vector<8x4x1xf32> to vector<8x4x1xf32>
    %58 = vector.broadcast %57 : vector<8x4x1xf32> to vector<8x4x128xf32>
    %59 = vector.shape_cast %54 : vector<8x4x1xf32> to vector<8x4x1xf32>
    %60 = vector.broadcast %59 : vector<8x4x1xf32> to vector<8x4x128xf32>
    %61 = arith.select %56, %58, %60 : vector<8x4x128xi1>, vector<8x4x128xf32>
    %62 = arith.mulf %27, %61 : vector<8x4x128xf32>
    %63 = arith.truncf %62 : vector<8x4x128xf32> to vector<8x4x128xbf16>
    %64 = vector.shape_cast %63 : vector<8x4x128xbf16> to vector<32x128xbf16>
    %65 = arith.mulf %28, %61 : vector<8x4x128xf32>
    %66 = arith.truncf %65 : vector<8x4x128xf32> to vector<8x4x128xbf16>
    %67 = vector.shape_cast %66 : vector<8x4x128xbf16> to vector<32x128xbf16>
    %c0_15 = arith.constant 0 : index
    %c0_16 = arith.constant 0 : index
    %68 = vector.load %arg2[%c0_15, %c0_16] : memref<128x128xbf16, #tpu.memory_space<vmem>>, vector<128x128xbf16>
    %cst_17 = arith.constant dense<0.000000e+00> : vector<32x128xf32>
    %69 = tpu.matmul %64, %68, %cst_17 {dimension_numbers = #tpu.dot_dimension_numbers<[1], [0], [0], [1], [0, 0, 1, 1], [], []>} : vector<32x128xbf16>, vector<128x128xbf16>, vector<32x128xf32> -> vector<32x128xf32>
    %c0_18 = arith.constant 0 : index
    %c0_19 = arith.constant 0 : index
    %70 = vector.load %arg3[%c0_18, %c0_19] : memref<128x128xbf16, #tpu.memory_space<vmem>>, vector<128x128xbf16>
    %cst_20 = arith.constant dense<0.000000e+00> : vector<32x128xf32>
    %71 = tpu.matmul %67, %70, %cst_20 {dimension_numbers = #tpu.dot_dimension_numbers<[1], [0], [0], [1], [0, 0, 1, 1], [], []>} : vector<32x128xbf16>, vector<128x128xbf16>, vector<32x128xf32> -> vector<32x128xf32>
    %72 = arith.addf %69, %71 : vector<32x128xf32>
    %c0_21 = arith.constant 0 : index
    %c0_22 = arith.constant 0 : index
    %73 = vector.load %arg4[%c0_21, %c0_22] : memref<1x128xf32, #tpu.memory_space<vmem>>, vector<1x128xf32>
    %74 = vector.broadcast %73 : vector<1x128xf32> to vector<32x128xf32>
    %75 = arith.addf %72, %74 : vector<32x128xf32>
    %76 = vector.shape_cast %75 : vector<32x128xf32> to vector<8x4x128xf32>
    %c0_23 = arith.constant 0 : index
    %c0_24 = arith.constant 0 : index
    %c0_25 = arith.constant 0 : index
    %77 = vector.load %arg5[%c0_23, %c0_24, %c0_25] : memref<8x4x128xf32, #tpu.memory_space<vmem>>, vector<8x4x128xf32>
    tpu.vector_store %arg5[%c0_23, %c0_24, %c0_25], %76 {strides = array<i32>} : memref<8x4x128xf32, #tpu.memory_space<vmem>>, vector<8x4x128xf32>,
    return
  }
  func.func @transform_0(%arg0: i32) -> (i32, i32, i32, i32) {
    %c0_i32 = arith.constant 0 : i32
    %c0_i32_0 = arith.constant 0 : i32
    %c0_i32_1 = arith.constant 0 : i32
    %c0_i32_2 = arith.constant 0 : i32
    return %arg0, %c0_i32, %c0_i32_0, %c0_i32_1 : i32, i32, i32, i32
  }
  func.func @transform_1(%arg0: i32) -> (i32, i32) {
    %c0_i32 = arith.constant 0 : i32
    %c0_i32_0 = arith.constant 0 : i32
    %c0_i32_1 = arith.constant 0 : i32
    return %c0_i32, %c0_i32_0 : i32, i32
  }
  func.func @transform_2(%arg0: i32) -> (i32, i32) {
    %c0_i32 = arith.constant 0 : i32
    %c0_i32_0 = arith.constant 0 : i32
    %c0_i32_1 = arith.constant 0 : i32
    return %c0_i32, %c0_i32_0 : i32, i32
  }
  func.func @transform_3(%arg0: i32) -> (i32, i32) {
    %c0_i32 = arith.constant 0 : i32
    %c0_i32_0 = arith.constant 0 : i32
    %c0_i32_1 = arith.constant 0 : i32
    return %c0_i32, %c0_i32_0 : i32, i32
  }
  func.func @transform_4(%arg0: i32) -> (i32, i32, i32) {
    %c0_i32 = arith.constant 0 : i32
    %c0_i32_0 = arith.constant 0 : i32
    %c0_i32_1 = arith.constant 0 : i32
    return %arg0, %c0_i32, %c0_i32_0 : i32, i32, i32
  }
}

</mosaic_0001>

<bundles_post_ra>
// kernel: tpu_custom_call.1
= control target key start
LH: loop header
LB: loop body
LE: loop exit
PB: predicated region body
PF: predicated region fallthrough
CT: control target
= control target key end

     0   :  { %9 = vsyncpa [#allocation3], 0  ;;  %s1954_s0 = inlined_call_operand.hbm [shape: f32[16,2,4,128], index: 0, kind: input, shape index: {}]   ;;  %s1955_s1 = inlined_call_operand.hbm [shape: bf16[128,128], index: 1, kind: input, shape index: {}]   ;;  %s1956_s2 = inlined_call_operand.hbm [shape: bf16[128,128], index: 2, kind: input, shape index: {}]   ;;  %s1957_s3 = inlined_call_operand.vmem [shape: f32[1,128], index: 3, kind: input, shape index: {}]   ;;  %s1958_s4 = inlined_call_operand.hbm [shape: f32[16,4,128], index: 4, kind: output, shape index: {}]  }
   0x1   :  { %11 = vsyncpa [#allocation3 + $0x1], 0 }
   0x2   :  { %12 = vsyncpa [#allocation6], 0 }
   0x3   :  { %13 = vsyncpa [#allocation4], 0 }
   0x4   :  { %15 = vsyncpa [#allocation4 + $0x1], 0  ;;  %s1441_s15 = smov 0   ;;  %s1443_s16 = smov 0  }
   0x5   :  { %s1445_s17 = smov 0   ;;  %s1447_s18 = smov 0  }
   0x6 LB: > { %s1462_s19 = sadd.s32 4294967295, %s1405_s18   ;;  %s1018_s20 = sadd.s32 4294967294, %s1405_s18   ;;  %s1405_s18 = sphi %s1447_s18, %s1978_s18   ;;  %s1401_s17 = sphi %s1445_s17, %s1977_s17   ;;  %s1397_s16 = sphi %s1443_s16, %s1976_s16   ;;  %s1393_s15 = sphi %s1441_s15, %s1975_s15  }
   0x7   : > { %p41_p0 = scmp.ne.s32.totalorder %s1397_s16, %s1393_s15  ;;  %p1959_p1 = scmp.eq.s32.totalorder %s1462_s19, 0 }
   0x8   : > { %p134_p3 = scmp.eq.s32.totalorder %s1018_s20, 1  ;;  %p1019_p5 = scmp.ge.s32.totalorder %s1405_s18, 1 }
   0x9   : > { %p1471_p4 = por %p1959_p1, %p41_p0  ;;  %p141_p7 = scmp.lt.s32.totalorder %s1405_s18, 3 }
   0xa   : > { %p1476_p6 = por %p134_p3, %p41_p0  ;;  %s1407_s24 = smov [#allocation5]  }
   0xb   : > { %s1962_s21 = scalar_select %p1471_p4, 1, 0 }
   0xc   : > { %s1963_s22 = scalar_select %p1476_p6, 1, 0 }
   0xd   : > { %p1481_p8 = pnand %p1019_p5, %p141_p7  ;;  %s153_s25 = sshll.u32 %s1407_s24, 4  ;;  %s1485_s25 = int_to_ptr.vmem [resolvable:$true] %s153_s25 }
   0xe   : > { %s1408_s27 = smov [#allocation7]   ;;  %s1249_s5 = scalar_lea.hbm %s1955_s1, 1024 }
   0xf   : > { %p1141_p9 = pneg %p1481_p8  ;;  %s166_s28 = sshll.u32 %s1408_s27, 4  ;;  %s1496_s28 = int_to_ptr.vmem [resolvable:$true] %s166_s28 }
  0x10   : > { %p1250_p12 = scmp.ne.s32.totalorder %s1955_s1, %s1249_s5  ;;  %p1256_p5 = scmp.lt.u32.totalorder %s1249_s5, %s1955_s1 }
  0x11   : > { %p1492_p11 = pnand %p1141_p9, %p1959_p1 }
  0x13   : > { %p1251_p13 = pneg %p1492_p11 }
  0x15   : > { %p1252_p0 = pnand %p1251_p13, %p1250_p12 }
  0x17   : > { %p1253_p3 = pneg %p1252_p0 }
  0x19   : > { %p1258_p7 = pnand %p1256_p5, %p1253_p3 }
  0x1b   : > { %1261 = shalt.err (!%p1258_p7)
}
  0x1c   : > { %s1262_s10 = scalar_lea.vmem %s1485_s25, 1024  ;;  %p1270_p2 = scmp.lt.s32.totalorder %s1485_s25, %s1485_s25 }
  0x1d   : > { %p1263_p9 = scmp.ne.s32.totalorder %s1485_s25, %s1262_s10  ;;  %p1271_p12 = scmp.lt.s32.totalorder %s1262_s10, %s1262_s10 }
  0x1f   : > { %p1265_p10 = pnand %p1263_p9, %p1251_p13  ;;  %p1272_p0 = por %p1271_p12, %p1270_p2 }
  0x21   : > { %p1266_p1 = pneg %p1265_p10 }
  0x23   : > { %p1273_p6 = pnand %p1272_p0, %p1266_p1 }
  0x25   : > { %1276 = shalt.err (!%p1273_p6)
}
  0x26   : > { %s1409_s11 = smov 64   ;;  %s1410_s12 = smov 4  }
  0x27   : > { %1144 = dma.hbm_to_vmem [thread:$0]  (!%p1492_p11), %s1955_s1, 1024, %s1485_s25, [#allocation6], %s1409_s11, %s1409_s11, %s1410_s12  }
  0x28   : > { %s1277_s27 = scalar_lea.hbm %s1956_s2, 1024 }
  0x29   : > { %p1278_p1 = scmp.ne.s32.totalorder %s1956_s2, %s1277_s27  ;;  %p1284_p10 = scmp.lt.u32.totalorder %s1277_s27, %s1956_s2 }
  0x2b   : > { %p1280_p2 = pnand %p1278_p1, %p1251_p13 }
  0x2d   : > { %p1281_p6 = pneg %p1280_p2 }
  0x2f   : > { %p1286_p3 = pnand %p1284_p10, %p1281_p6 }
  0x31   : > { %1289 = shalt.err (!%p1286_p3)
}
  0x32   : > { %s1290_s25 = scalar_lea.vmem %s1496_s28, 1024  ;;  %p1298_p12 = scmp.lt.s32.totalorder %s1496_s28, %s1496_s28 }
  0x33   : > { %p1291_p5 = scmp.ne.s32.totalorder %s1496_s28, %s1290_s25  ;;  %p1299_p0 = scmp.lt.s32.totalorder %s1290_s25, %s1290_s25 }
  0x35   : > { %p1293_p7 = pnand %p1291_p5, %p1251_p13  ;;  %p1300_p1 = por %p1299_p0, %p1298_p12 }
  0x37   : > { %p1294_p9 = pneg %p1293_p7 }
  0x39   : > { %p1301_p2 = pnand %p1300_p1, %p1294_p9 }
  0x3b   : > { %1304 = shalt.err (!%p1301_p2)
}
  0x3c   : > { %1147 = dma.hbm_to_vmem [thread:$0]  (!%p1492_p11), %s1956_s2, 1024, %s1496_s28, [#allocation6], %s1409_s11, %s1409_s11, %s1410_s12  }
  0x3d   : > { %s1557_s26 = sadd.s32 1, %s1405_s18   ;;  %s28_s9 = sadd.s32 1, %s1401_s17 }
  0x3e   : > { %s25_s10 = ssub.s32 %s1405_s18, %s1557_s26  ;;  %p35_p13 = scmp.ne.s32.totalorder %s1401_s17, %s1397_s16 }
  0x3f   : > { %p26_p6 = scmp.eq.s32.totalorder %s25_s10, 0  ;;  %p36_p10 = scmp.eq.s32.totalorder %s1405_s18, 0 }
  0x40   : > { %p1966_p3 = scmp.eq.s32.totalorder %s1462_s19, 1  ;;  %p1158_p7 = scmp.lt.s32.totalorder %s1405_s18, 2 }
  0x41   : > { %s1573_s14 = scalar_select %p26_p6, %s1401_s17, %s28_s9  }
  0x42   : > { %p1567_p5 = por %p1966_p3, %p35_p13  ;;  %p37_p9 = por %p36_p10, %p35_p13 }
  0x43   : > { %s183_s20 = sand.u32 1, %s1401_s17   ;;  %s1063_s28 = sshll.u32 %s1405_s18, 10 }
  0x44   : > { %s1967_s13 = scalar_select %p1567_p5, 1, 0 }
  0x45   : > { %s1023_s24 = sshll.u32 %s183_s20, 6  ;;  %s1580_s30 = scalar_lea.hbm %s1954_s0, %s1063_s28 }
  0x46   : > { %s187_s5 = scalar_lea.vmem [#allocation2], %s1023_s24  ;;  %p1584_p11 = pnand %p1158_p7, %p37_p9 }
  0x47   : > { %s195_s6 = sshll.u32 %s187_s5, 4  ;;  %s1588_s7 = scalar_lea.sflag [#allocation3], %s183_s20  ;;  %s1582_s6 = int_to_ptr.vmem [resolvable:$true] %s195_s6 }
  0x48   : > { %s1305_s8 = scalar_lea.hbm %s1580_s30, 1024  ;;  %p1307_p0 = pneg %p1584_p11 }
  0x49   : > { %p1306_p12 = scmp.ne.s32.totalorder %s1580_s30, %s1305_s8  ;;  %s1310_s24 = scalar_lea.hbm %s1954_s0, 2048 }
  0x4a   : > { %p1311_p13 = scmp.lt.u32.totalorder %s1580_s30, %s1954_s0  ;;  %p1312_p6 = scmp.lt.u32.totalorder %s1310_s24, %s1305_s8 }
  0x4b   : > { %p1308_p1 = pnand %p1307_p0, %p1306_p12  ;;  %p1314_p3 = scmp.lt.u32.totalorder %s1305_s8, %s1580_s30 }
  0x4c   : > { %p1313_p10 = por %p1312_p6, %p1311_p13 }
  0x4d   : > { %p1309_p2 = pneg %p1308_p1 }
  0x4e   : > { %p1315_p7 = por %p1314_p3, %p1313_p10 }
  0x50   : > { %p1316_p9 = pnand %p1315_p7, %p1309_p2 }
  0x52   : > { %1319 = shalt.err (!%p1316_p9)
}
  0x53   : > { %s1320_s20 = scalar_lea.vmem %s1582_s6, 1024  ;;  %s1411_s29 = smov [#allocation2]  }
  0x54   : > { %p1321_p12 = scmp.ne.s32.totalorder %s1582_s6, %s1320_s20  ;;  %s1325_s5 = sshll.u32 %s1411_s29, 4  ;;  %s1326_s5 = int_to_ptr.vmem [resolvable:$false] %s1325_s5 }
  0x55   : > { %s1327_s9 = scalar_lea.vmem %s1326_s5, 2048  ;;  %p1328_p4 = scmp.lt.s32.totalorder %s1582_s6, %s1326_s5 }
  0x56   : > { %p1323_p1 = pnand %p1321_p12, %p1307_p0  ;;  %p1329_p13 = scmp.lt.s32.totalorder %s1327_s9, %s1320_s20 }
  0x58   : > { %p1324_p5 = pneg %p1323_p1  ;;  %p1330_p6 = por %p1329_p13, %p1328_p4 }
  0x5a   : > { %p1331_p10 = pnand %p1330_p6, %p1324_p5 }
  0x5c   : > { %1334 = shalt.err (!%p1331_p10)
}
  0x5d   : > { %1151 = dma.hbm_to_vmem [thread:$0]  (!%p1584_p11), %s1580_s30, 1024, %s1582_s6, %s1588_s7, %s1409_s11, %s1409_s11, %s1410_s12  }
  0x5e   : > { %207 = sbr.rel (%p1481_p8) target bundleno = 715 (0x2cb), region = 36  ;;  %s1622_s8 = sand.u32 (!%p1481_p8), 1, %s1397_s16  }
  0x5f   : > { %s1028_s10 = sshll.u32 (!%p1481_p8), %s1622_s8, 6  ;;  %s210_s24 = scalar_lea.sflag (!%p1481_p8), [#allocation3], %s1622_s8 }
  0x60   : > { %s1626_s28 = scalar_lea.vmem (!%p1481_p8), [#allocation2], %s1028_s10  ;;  %p1969_p4 = scmp.ne.s32.totalorder (!%p1481_p8), %s1962_s21, 0 }
  0x65   : > { %1380 = dma.done.wait (%p1969_p4), %s210_s24, 1024  }
  0x66   : > { %1382 = vsyncadd (%p1969_p4), %s210_s24, 4294966272  ;;  %p1970_p5 = scmp.eq.s32.totalorder %s1462_s19, 0 }
  0x68   : > { %1384 = dma.done.wait (%p1970_p5), [#allocation6], 2048   ;;  %p1971_p8 = pmov %p1970_p5 }
  0x69   : > { %v273_v0 = vlaneseq  ;;  %vm286_vm0 = vcmask 1043456   ;;  %v1641_v2 = vld [vmem:[%s1626_s28 + $0x8] sm:$0xf]  ;;  %v1644_v3 = vld [vmem:[%s1626_s28 + $0xc] sm:$0xf]  ;;  %s1031_s21 = sshll.u32 %s1622_s8, 5 }
  0x6a   : > { %1386 = vsyncadd (%p1971_p8), [#allocation6], 4294965248  ;;  %v1647_v4 = vld [vmem:[%s1626_s28] sm:$0xf]  ;;  %v266_v5 = vadd.f32 %v1644_v3, %v1641_v2  ;;  %v1652_v6 = vld [vmem:[%s1626_s28 + $0x4] sm:$0xf] }
  0x6b   : > { %v1637_v1 = vand.u32 127, %v273_v0  ;;  %v1655_v7 = vld [vmem:[%s1626_s28 + $0x18] sm:$0xf]  ;;  %v1658_v8 = vld [vmem:[%s1626_s28 + $0x1c] sm:$0xf]  ;;  %v265_v9 = vadd.f32 %v1652_v6, %v1647_v4  ;;  %s245_s12 = scalar_lea.vmem [#allocation8], %s1031_s21 }
  0x6c   : > { %v268_v10 = vadd.f32 %v1658_v8, %v1655_v7  ;;  %v1665_v11 = vld [vmem:[%s1626_s28 + $0x10] sm:$0xf]  ;;  %v1668_v12 = vld [vmem:[%s1626_s28 + $0x14] sm:$0xf]  ;;  %v1671_v13 = vld [vmem:[%s1626_s28 + $0x28] sm:$0xf] }
  0x6d   : > { %vm275_vm1 = vcmp.lt.s32.totalorder %v1637_v1, 64  ;;  %v314_v14 = vsel %vm286_vm0, %v266_v5, 0.0  ;;  %v267_v15 = vadd.f32 %v1668_v12, %v1665_v11  ;;  %v1677_v16 = vld [vmem:[%s1626_s28 + $0x2c] sm:$0xf]  ;;  %v1680_v17 = vld [vmem:[%s1626_s28 + $0x20] sm:$0xf] }
  0x6e   : > { %315 = vadd.xlane.f32.xlu1 %v314_v14  ;;  %v311_v18 = vsel %vm286_vm0, %v265_v9, 0.0  ;;  %v1684_v19 = vld [vmem:[%s1626_s28 + $0x24] sm:$0xf]  ;;  %v320_v20 = vsel %vm286_vm0, %v268_v10, 0.0  ;;  %v278_v21 = vsel %vm275_vm1, %v265_v9, 0.0  ;;  %v281_v22 = vsel %vm275_vm1, %v268_v10, 0.0 }
  0x6f   : > { %312 = vadd.xlane.f32.xlu0 %v311_v18  ;;  %v279_v23 = vsel %vm275_vm1, %v266_v5, 0.0  ;;  %v1694_v24 = vld [vmem:[%s1626_s28 + $0x38] sm:$0xf]  ;;  %v317_v25 = vsel %vm286_vm0, %v267_v15, 0.0  ;;  %v280_v26 = vsel %vm275_vm1, %v267_v15, 0.0  ;;  %v270_v27 = vadd.f32 %v1677_v16, %v1671_v13  ;;  %s926_s30 = sshll.u32 %s245_s12, 4  ;;  %s1905_s30 = int_to_ptr.vmem [resolvable:$true] %s926_s30 }
  0x70   : > { %v269_v28 = vadd.f32 %v1684_v19, %v1680_v17  ;;  %v1704_v29 = vld [vmem:[%s1626_s28 + $0x3c] sm:$0xf]  ;;  %v1707_v30 = vld [vmem:[%s1626_s28 + $0x30] sm:$0xf]  ;;  %v1712_v32 = vld [vmem:[%s1626_s28 + $0x34] sm:$0xf] }
  0x71   : > { %v272_v31 = vadd.f32 %v1704_v29, %v1694_v24  ;;  %v283_v33 = vsel %vm275_vm1, %v270_v27, 0.0  ;;  %v271_v35 = vadd.f32 %v1712_v32, %v1707_v30  ;;  %v293_v36 = vsel %vm286_vm0, %v280_v26, 0.0  ;;  %s1064_s6 = sshll.u32 %s1462_s19, 9  ;;  %s913_s27 = scalar_lea.sflag [#allocation4], %s1622_s8 }
  0x72   : > { %321 = vadd.xlane.f32.xlu1 %v320_v20  ;;  %v282_v34 = vsel %vm275_vm1, %v269_v28, 0.0  ;;  %v287_v37 = vsel %vm286_vm0, %v278_v21, 0.0  ;;  %v296_v38 = vsel %vm286_vm0, %v281_v22, 0.0  ;;  %v290_v39 = vsel %vm286_vm0, %v279_v23, 0.0  ;;  %s1910_s19 = scalar_lea.hbm %s1958_s4, %s1064_s6  ;;  %s1335_s20 = scalar_lea.vmem %s1905_s30, 512 }
  0x73   : > { %318 = vadd.xlane.f32.xlu0 %v317_v25  ;;  %v302_v40 = vsel %vm286_vm0, %v283_v33, 0.0  ;;  %v299_v41 = vsel %vm286_vm0, %v282_v34, 0.0  ;;  %v285_v42 = vsel %vm275_vm1, %v272_v31, 0.0  ;;  %v284_v43 = vsel %vm275_vm1, %v271_v35, 0.0  ;;  %p1336_p11 = scmp.ne.s32.totalorder %s1905_s30, %s1335_s20  ;;  %p1972_p0 = scmp.ne.s32.totalorder %s1967_s13, 0 }
  0x74   : > { %v308_v44 = vsel %vm286_vm0, %v285_v42, 0.0  ;;  %v305_v45 = vsel %vm286_vm0, %v284_v43, 0.0  ;;  %v326_v46 = vsel %vm286_vm0, %v270_v27, 0.0  ;;  %v323_v47 = vsel %vm286_vm0, %v269_v28, 0.0  ;;  %s1413_s29 = smov [#allocation8]  }
  0x75   : > { %v332_v48 = vsel %vm286_vm0, %v272_v31, 0.0  ;;  %v329_v49 = vsel %vm286_vm0, %v271_v35, 0.0  ;;  %p1337_p2 = pnand %p1336_p11, %p1972_p0  ;;  %s1339_s5 = sshll.u32 %s1413_s29, 4  ;;  %s1340_s5 = int_to_ptr.vmem [resolvable:$false] %s1339_s5 }
  0x76   : > { %294 = vadd.xlane.f32.xlu1 %v293_v36  ;;  %s1341_s9 = scalar_lea.vmem %s1340_s5, 1024  ;;  %p1342_p7 = scmp.lt.s32.totalorder %s1905_s30, %s1340_s5 }
  0x77   : > { %288 = vadd.xlane.f32.xlu0 %v287_v37  ;;  %p1338_p3 = pneg %p1337_p2  ;;  %p1343_p9 = scmp.lt.s32.totalorder %s1341_s9, %s1335_s20 }
  0x79   : > { %p1344_p12 = por %p1343_p9, %p1342_p7 }
  0x7a   : > { %297 = vadd.xlane.f32.xlu1 %v296_v38 }
  0x7b   : > { %291 = vadd.xlane.f32.xlu0 %v290_v39  ;;  %p1345_p1 = pnand %p1344_p12, %p1338_p3 }
  0x7e   : > { %303 = vadd.xlane.f32.xlu1 %v302_v40 }
  0x7f   : > { %300 = vadd.xlane.f32.xlu0 %v299_v41 }
  0x82   : > { %309 = vadd.xlane.f32.xlu1 %v308_v44 }
  0x83   : > { %306 = vadd.xlane.f32.xlu0 %v305_v45 }
  0x86   : > { %327 = vadd.xlane.f32.xlu1 %v326_v46 }
  0x87   : > { %324 = vadd.xlane.f32.xlu0 %v323_v47 }
  0x8a   : > { %333 = vadd.xlane.f32.xlu1 %v332_v48 }
  0x8b   : > { %330 = vadd.xlane.f32.xlu0 %v329_v49 }
  0xfb   : > { %v316_v50 = vpop.xlane.xlu1 %315 }
  0xfc   : > { %v313_v51 = vpop.xlane.xlu0 %312 }
  0xff   : > { %v322_v52 = vpop.xlane.xlu1 %321 }
 0x100   : > { %v319_v53 = vpop.xlane.xlu0 %318 }
 0x103   : > { %v295_v54 = vpop.xlane.xlu1 %294 }
 0x104   : > { %v337_v55 = vsub.f32 %v319_v53, %v295_v54  ;;  %v289_v56 = vpop.xlane.xlu0 %288 }
 0x105   : > { %v335_v57 = vsub.f32 %v313_v51, %v289_v56 }
 0x106   : > { %v345_v58 = vsel %vm275_vm1, %v295_v54, %v337_v55 }
 0x107   : > { %v353_v59 = vmul.f32 0.0078125, %v345_v58  ;;  %v343_v60 = vsel %vm275_vm1, %v289_v56, %v335_v57  ;;  %v298_v61 = vpop.xlane.xlu1 %297 }
 0x108   : > { %v351_v62 = vmul.f32 0.0078125, %v343_v60  ;;  %v338_v63 = vsub.f32 %v322_v52, %v298_v61  ;;  %v292_v5 = vpop.xlane.xlu0 %291 }
 0x109   : > { %v1741_v9 = vsub.f32 %v1665_v11, %v353_v59  ;;  %v1744_v10 = vsub.f32 %v1668_v12, %v353_v59  ;;  %v336_v14 = vsub.f32 %v316_v50, %v292_v5 }
 0x10a   : > { %v1747_v15 = vsub.f32 %v1647_v4, %v351_v62  ;;  %v1750_v18 = vsub.f32 %v1652_v6, %v351_v62  ;;  %v346_v20 = vsel %vm275_vm1, %v298_v61, %v338_v63 }
 0x10b   : > { %v354_v21 = vmul.f32 0.0078125, %v346_v20  ;;  %v344_v22 = vsel %vm275_vm1, %v292_v5, %v336_v14  ;;  %v304_v23 = vpop.xlane.xlu1 %303  ;;  %v377_v11 = vmul.f32 %v1741_v9, %v1741_v9  ;;  %v385_v12 = vmul.f32 %v1744_v10, %v1744_v10 }
 0x10c   : > { %v352_v25 = vmul.f32 0.0078125, %v344_v22  ;;  %v301_v4 = vpop.xlane.xlu0 %300  ;;  %v375_v6 = vmul.f32 %v1747_v15, %v1747_v15  ;;  %v383_v26 = vmul.f32 %v1750_v18, %v1750_v18 }
 0x10d   : > { %v1765_v27 = vsub.f32 %v1655_v7, %v354_v21  ;;  %v1768_v28 = vsub.f32 %v1658_v8, %v354_v21  ;;  %v393_v36 = vadd.f32 %v385_v12, %v377_v11 }
 0x10e   : > { %v1771_v31 = vsub.f32 %v1641_v2, %v352_v25  ;;  %v1774_v33 = vsub.f32 %v1644_v3, %v352_v25  ;;  %v391_v34 = vadd.f32 %v383_v26, %v375_v6 }
 0x10f   : > { %v310_v35 = vpop.xlane.xlu1 %309  ;;  %v378_v37 = vmul.f32 %v1765_v27, %v1765_v27  ;;  %v386_v2 = vmul.f32 %v1768_v28, %v1768_v28  ;;  %v437_v43 = vsel %vm286_vm0, %v393_v36, 0.0 }
 0x110   : > { %v307_v38 = vpop.xlane.xlu0 %306  ;;  %v431_v39 = vsel %vm286_vm0, %v391_v34, 0.0  ;;  %v376_v7 = vmul.f32 %v1771_v31, %v1771_v31  ;;  %v384_v8 = vmul.f32 %v1774_v33, %v1774_v33 }
 0x111   : > { %432 = vadd.xlane.f32.xlu0 %v431_v39  ;;  %v394_v45 = vadd.f32 %v386_v2, %v378_v37 }
 0x112   : > { %v392_v3 = vadd.f32 %v384_v8, %v376_v7 }
 0x113   : > { %v328_v40 = vpop.xlane.xlu1 %327  ;;  %v440_v54 = vsel %vm286_vm0, %v394_v45, 0.0  ;;  %v402_v6 = vsel %vm275_vm1, %v394_v45, 0.0 }
 0x114   : > { %v340_v41 = vsub.f32 %v328_v40, %v304_v23  ;;  %v325_v42 = vpop.xlane.xlu0 %324  ;;  %v434_v44 = vsel %vm286_vm0, %v392_v3, 0.0  ;;  %v400_v11 = vsel %vm275_vm1, %v392_v3, 0.0  ;;  %v416_v37 = vsel %vm286_vm0, %v402_v6, 0.0 }
 0x115   : > { %v339_v46 = vsub.f32 %v325_v42, %v301_v4  ;;  %438 = vadd.xlane.f32.xlu0 %v437_v43  ;;  %435 = vadd.xlane.f32.xlu1 %v434_v44 }
 0x116   : > { %v348_v47 = vsel %vm275_vm1, %v304_v23, %v340_v41 }
 0x117   : > { %v356_v48 = vmul.f32 0.0078125, %v348_v47  ;;  %v347_v49 = vsel %vm275_vm1, %v301_v4, %v339_v46  ;;  %v334_v50 = vpop.xlane.xlu1 %333  ;;  %v410_v4 = vsel %vm286_vm0, %v400_v11, 0.0  ;;  %v1201_v46 = vld [vmem:[#allocation7] sm:$0xff]  }
 0x118   : > { %v355_v51 = vmul.f32 0.0078125, %v347_v49  ;;  %v342_v52 = vsub.f32 %v334_v50, %v310_v35  ;;  %v331_v53 = vpop.xlane.xlu0 %330  ;;  %v1202_v47 = vld [vmem:[#allocation5] sm:$0xff]   ;;  %1085 = vmatprep.subr.bf16.mxu1 %v1201_v46  ;;  %v1204_v49 = vld [vmem:[#allocation5 + $0x8] sm:$0xff]   ;;  %v1205_v50 = vld [vmem:[#allocation7 + $0x10] sm:$0xff]  }
 0x119   : > { %v341_v55 = vsub.f32 %v331_v53, %v307_v38  ;;  %441 = vadd.xlane.f32.xlu1 %v440_v54  ;;  %v1793_v56 = vsub.f32 %v1671_v13, %v356_v48  ;;  %v1796_v57 = vsub.f32 %v1677_v16, %v356_v48  ;;  %1105 = vmatprep.subr.bf16.mxu0 %v1202_v47  ;;  %v1203_v48 = vld [vmem:[#allocation7 + $0x8] sm:$0xff]   ;;  %v1208_v53 = vld [vmem:[#allocation5 + $0x18] sm:$0xff]   ;;  %v1209_v54 = vld [vmem:[#allocation7 + $0x20] sm:$0xff]  }
 0x11a   : > { %v350_v58 = vsel %vm275_vm1, %v310_v35, %v342_v52  ;;  %v1801_v59 = vsub.f32 %v1680_v17, %v355_v51  ;;  %v1804_v60 = vsub.f32 %v1684_v19, %v355_v51  ;;  %1086 = vmatpush3.bf16.msra.mxu1 %v1201_v46  ;;  %1106 = vmatpush3.bf16.msra.mxu0 %v1202_v47  ;;  %v1206_v51 = vld [vmem:[#allocation5 + $0x10] sm:$0xff]   ;;  %v1207_v52 = vld [vmem:[#allocation7 + $0x18] sm:$0xff]  }
 0x11b   : > { %v349_v61 = vsel %vm275_vm1, %v307_v38, %v341_v55  ;;  %v380_v62 = vmul.f32 %v1793_v56, %v1793_v56  ;;  %v388_v13 = vmul.f32 %v1796_v57, %v1796_v57  ;;  %v358_v16 = vmul.f32 0.0078125, %v350_v58  ;;  %1087 = vmatprep.subr.bf16.mxu1 %v1203_v48  ;;  %1107 = vmatprep.subr.bf16.mxu0 %v1204_v49  ;;  %v1210_v55 = vld [vmem:[#allocation5 + $0x20] sm:$0xff]   ;;  %v1211_v58 = vld [vmem:[#allocation7 + $0x28] sm:$0xff]  }
 0x11c   : > { %v379_v63 = vmul.f32 %v1801_v59, %v1801_v59  ;;  %v387_v17 = vmul.f32 %v1804_v60, %v1804_v60  ;;  %v357_v5 = vmul.f32 0.0078125, %v349_v61  ;;  %v1212_v61 = vld [vmem:[#allocation5 + $0x28] sm:$0xff]  }
 0x11d   : > { %v396_v14 = vadd.f32 %v388_v13, %v380_v62  ;;  %v1818_v21 = vsub.f32 %v1694_v24, %v358_v16  ;;  %v1821_v22 = vsub.f32 %v1704_v29, %v358_v16  ;;  %v399_v24 = vsel %vm275_vm1, %v391_v34, 0.0  ;;  %v1213_v62 = vld [vmem:[#allocation7 + $0x30] sm:$0xff]   ;;  %v1215_v16 = vld [vmem:[#allocation7 + $0x38] sm:$0xff]  }
 0x11e   : > { %v395_v19 = vadd.f32 %v387_v17, %v379_v63  ;;  %v1827_v12 = vsub.f32 %v1707_v30, %v357_v5  ;;  %v1830_v25 = vsub.f32 %v1712_v32, %v357_v5  ;;  %v407_v29 = vsel %vm286_vm0, %v399_v24, 0.0  ;;  %1088 = vmatpush3.bf16.msra.mxu1 %v1203_v48  ;;  %1108 = vmatpush3.bf16.msra.mxu0 %v1204_v49  ;;  %v1214_v13 = vld [vmem:[#allocation5 + $0x30] sm:$0xff]   ;;  %v1216_v63 = vld [vmem:[#allocation5 + $0x38] sm:$0xff]  }
 0x11f   : > { %v446_v20 = vsel %vm286_vm0, %v396_v14, 0.0  ;;  %v382_v26 = vmul.f32 %v1818_v21, %v1818_v21  ;;  %v390_v30 = vmul.f32 %v1821_v22, %v1821_v22  ;;  %v401_v32 = vsel %vm275_vm1, %v393_v36, 0.0  ;;  %1089 = vmatprep.subr.bf16.mxu1 %v1205_v50  ;;  %1109 = vmatprep.subr.bf16.mxu0 %v1206_v51 }
 0x120   : > { %447 = vadd.xlane.f32.xlu1 %v446_v20  ;;  %v443_v23 = vsel %vm286_vm0, %v395_v19, 0.0  ;;  %v381_v34 = vmul.f32 %v1827_v12, %v1827_v12  ;;  %v389_v35 = vmul.f32 %v1830_v25, %v1830_v25  ;;  %v413_v38 = vsel %vm286_vm0, %v401_v32, 0.0 }
 0x121   : > { %444 = vadd.xlane.f32.xlu0 %v443_v23  ;;  %v404_v39 = vsel %vm275_vm1, %v396_v14, 0.0  ;;  %v398_v7 = vadd.f32 %v390_v30, %v382_v26  ;;  %v403_v8 = vsel %vm275_vm1, %v395_v19, 0.0 }
 0x122   : > { %v397_v36 = vadd.f32 %v389_v35, %v381_v34  ;;  %v422_v2 = vsel %vm286_vm0, %v404_v39, 0.0  ;;  %v419_v3 = vsel %vm286_vm0, %v403_v8, 0.0  ;;  %1090 = vmatpush3.bf16.msra.mxu1 %v1205_v50  ;;  %1110 = vmatpush3.bf16.msra.mxu0 %v1206_v51 }
 0x123   : > { %v406_v40 = vsel %vm275_vm1, %v398_v7, 0.0  ;;  %v452_v44 = vsel %vm286_vm0, %v398_v7, 0.0  ;;  %1091 = vmatprep.subr.bf16.mxu1 %v1207_v52  ;;  %1111 = vmatprep.subr.bf16.mxu0 %v1208_v53 }
 0x124   : > { %411 = vadd.xlane.f32.xlu1 %v410_v4  ;;  %v405_v41 = vsel %vm275_vm1, %v397_v36, 0.0  ;;  %v428_v42 = vsel %vm286_vm0, %v406_v40, 0.0  ;;  %v449_v45 = vsel %vm286_vm0, %v397_v36, 0.0 }
 0x125   : > { %408 = vadd.xlane.f32.xlu0 %v407_v29  ;;  %v425_v43 = vsel %vm286_vm0, %v405_v41, 0.0 }
 0x126   : > { %1092 = vmatpush3.bf16.msra.mxu1 %v1207_v52  ;;  %1112 = vmatpush3.bf16.msra.mxu0 %v1208_v53 }
 0x127   : > { %1093 = vmatprep.subr.bf16.mxu1 %v1209_v54  ;;  %1113 = vmatprep.subr.bf16.mxu0 %v1210_v55 }
 0x128   : > { %417 = vadd.xlane.f32.xlu1 %v416_v37 }
 0x129   : > { %414 = vadd.xlane.f32.xlu0 %v413_v38  ;;  %v1412_v38 = vmov 1983009808  }
 0x12a   : > { %1094 = vmatpush3.bf16.msra.mxu1 %v1209_v54  ;;  %1114 = vmatpush3.bf16.msra.mxu0 %v1210_v55  ;;  %v1864_v39 = vunpack.c.l.s4 %v1412_v38 }
 0x12b   : > { %1095 = vmatprep.subr.bf16.mxu1 %v1211_v58  ;;  %1115 = vmatprep.subr.bf16.mxu0 %v1212_v61 }
 0x12c   : > { %423 = vadd.xlane.f32.xlu1 %v422_v2 }
 0x12d   : > { %420 = vadd.xlane.f32.xlu0 %v419_v3 }
 0x12e   : > { %1096 = vmatpush3.bf16.msra.mxu1 %v1211_v58  ;;  %1116 = vmatpush3.bf16.msra.mxu0 %v1212_v61 }
 0x12f   : > { %1097 = vmatprep.subr.bf16.mxu1 %v1213_v62  ;;  %1117 = vmatprep.subr.bf16.mxu0 %v1214_v13 }
 0x130   : > { %429 = vadd.xlane.f32.xlu1 %v428_v42 }
 0x131   : > { %426 = vadd.xlane.f32.xlu0 %v425_v43 }
 0x132   : > { %1098 = vmatpush3.bf16.msra.mxu1 %v1213_v62  ;;  %1118 = vmatpush3.bf16.msra.mxu0 %v1214_v13 }
 0x133   : > { %1099 = vmatprep.subr.bf16.mxu1 %v1215_v16  ;;  %1119 = vmatprep.subr.bf16.mxu0 %v1216_v63 }
 0x134   : > { %453 = vadd.xlane.f32.xlu1 %v452_v44 }
 0x135   : > { %450 = vadd.xlane.f32.xlu0 %v449_v45 }
 0x136   : > { %1100 = vmatpush3.bf16.msra.mxu1 %v1215_v16  ;;  %1120 = vmatpush3.bf16.msra.mxu0 %v1216_v63 }
 0x19e   : > { %v433_v5 = vpop.xlane.xlu0 %432 }
 0x1a2   : > { %v436_v17 = vpop.xlane.xlu1 %435  ;;  %v439_v19 = vpop.xlane.xlu0 %438 }
 0x1a6   : > { %v442_v14 = vpop.xlane.xlu1 %441 }
 0x1ad   : > { %v448_v20 = vpop.xlane.xlu1 %447 }
 0x1ae   : > { %v445_v23 = vpop.xlane.xlu0 %444 }
 0x1b1   : > { %v412_v11 = vpop.xlane.xlu1 %411 }
 0x1b2   : > { %v456_v24 = vsub.f32 %v436_v17, %v412_v11  ;;  %v464_v4 = vmul.f32 0.0078125, %v412_v11  ;;  %v409_v29 = vpop.xlane.xlu0 %408 }
 0x1b3   : > { %v455_v6 = vsub.f32 %v433_v5, %v409_v29  ;;  %v463_v26 = vmul.f32 0.0078125, %v409_v29 }
 0x1b4   : > { %v472_v30 = vmax.f32 %v464_v4, 0.0  ;;  %v496_v32 = vmul.f32 0.0078125, %v456_v24 }
 0x1b5   : > { %v471_v34 = vmax.f32 %v463_v26, 0.0  ;;  %v495_v35 = vmul.f32 0.0078125, %v455_v6  ;;  %v418_v37 = vpop.xlane.xlu1 %417 }
 0x1b6   : > { %v480_v7 = vadd.f32 1e-05, %v472_v30  ;;  %v504_v8 = vmax.f32 %v496_v32, 0.0  ;;  %v458_v36 = vsub.f32 %v442_v14, %v418_v37  ;;  %v466_v2 = vmul.f32 0.0078125, %v418_v37  ;;  %v415_v3 = vpop.xlane.xlu0 %414 }
 0x1b7   : > { %v479_v40 = vadd.f32 1e-05, %v471_v34  ;;  %v503_v41 = vmax.f32 %v495_v35, 0.0  ;;  %v457_v42 = vsub.f32 %v439_v19, %v415_v3  ;;  %v465_v43 = vmul.f32 0.0078125, %v415_v3 }
 0x1b8   : > { %1217 = vrsqrt.f32 %v480_v7  ;;  %v512_v44 = vadd.f32 1e-05, %v504_v8  ;;  %v474_v45 = vmax.f32 %v466_v2, 0.0  ;;  %v498_v46 = vmul.f32 0.0078125, %v458_v36 }
 0x1b9   : > { %1219 = vrsqrt.f32 %v479_v40  ;;  %v511_v47 = vadd.f32 1e-05, %v503_v41  ;;  %v473_v48 = vmax.f32 %v465_v43, 0.0  ;;  %v497_v49 = vmul.f32 0.0078125, %v457_v42  ;;  %v424_v50 = vpop.xlane.xlu1 %423 }
 0x1ba   : > { %1221 = vrsqrt.f32 %v512_v44  ;;  %v482_v51 = vadd.f32 1e-05, %v474_v45  ;;  %v506_v52 = vmax.f32 %v498_v46, 0.0  ;;  %v460_v53 = vsub.f32 %v448_v20, %v424_v50  ;;  %v421_v54 = vpop.xlane.xlu0 %420 }
 0x1bb   : > { %1223 = vrsqrt.f32 %v511_v47  ;;  %v481_v55 = vadd.f32 1e-05, %v473_v48  ;;  %v505_v58 = vmax.f32 %v497_v49, 0.0  ;;  %v468_v61 = vmul.f32 0.0078125, %v424_v50 }
 0x1bc   : > { %1225 = vrsqrt.f32 %v482_v51  ;;  %v514_v62 = vadd.f32 1e-05, %v506_v52  ;;  %v500_v13 = vmul.f32 0.0078125, %v460_v53  ;;  %v459_v16 = vsub.f32 %v445_v23, %v421_v54 }
 0x1bd   : > { %1227 = vrsqrt.f32 %v481_v55  ;;  %v513_v63 = vadd.f32 1e-05, %v505_v58  ;;  %v476_v17 = vmax.f32 %v468_v61, 0.0  ;;  %v467_v5 = vmul.f32 0.0078125, %v421_v54  ;;  %v430_v14 = vpop.xlane.xlu1 %429 }
 0x1be   : > { %1229 = vrsqrt.f32 %v514_v62  ;;  %v508_v19 = vmax.f32 %v500_v13, 0.0  ;;  %v499_v11 = vmul.f32 0.0078125, %v459_v16  ;;  %v470_v24 = vmul.f32 0.0078125, %v430_v14  ;;  %v427_v4 = vpop.xlane.xlu0 %426 }
 0x1bf   : > { %1231 = vrsqrt.f32 %v513_v63  ;;  %v484_v20 = vadd.f32 1e-05, %v476_v17  ;;  %v475_v29 = vmax.f32 %v467_v5, 0.0  ;;  %v469_v6 = vmul.f32 0.0078125, %v427_v4 }
 0x1c0   : > { %v516_v26 = vadd.f32 1e-05, %v508_v19  ;;  %v507_v30 = vmax.f32 %v499_v11, 0.0  ;;  %v478_v32 = vmax.f32 %v470_v24, 0.0  ;;  %v611_v3 = vunpack.c.0.s8 %v1864_v39 }
 0x1c1   : > { %v483_v34 = vadd.f32 1e-05, %v475_v29  ;;  %v477_v35 = vmax.f32 %v469_v6, 0.0  ;;  %v454_v23 = vpop.xlane.xlu1 %453  ;;  %v613_v43 = vshrl.u32 %v273_v0, 7 }
 0x1c2   : > { %v1218_v37 = vpop.eup %1217  ;;  %1233 = vrsqrt.f32 %v516_v26  ;;  %v515_v38 = vadd.f32 1e-05, %v507_v30  ;;  %v462_v7 = vsub.f32 %v454_v23, %v430_v14  ;;  %v451_v8 = vpop.xlane.xlu0 %450  ;;  %v486_v41 = vadd.f32 1e-05, %v478_v32 }
 0x1c3   : > { %v1220_v36 = vpop.eup %1219  ;;  %1235 = vrsqrt.f32 %v484_v20  ;;  %v461_v2 = vsub.f32 %v451_v8, %v427_v4  ;;  %v485_v45 = vadd.f32 1e-05, %v477_v35  ;;  %v614_v61 = vsub.s32 %v611_v3, %v613_v43 }
 0x1c4   : > { %v1222_v40 = vpop.eup %1221  ;;  %1237 = vrsqrt.f32 %v515_v38  ;;  %v502_v42 = vmul.f32 0.0078125, %v462_v7 }
 0x1c5   : > { %v1224_v44 = vpop.eup %1223  ;;  %1239 = vrsqrt.f32 %v483_v34  ;;  %v501_v46 = vmul.f32 0.0078125, %v461_v2  ;;  %v528_v47 = vsel %vm275_vm1, %v1218_v37, %v1222_v40 }
 0x1c6   : > { %v1226_v48 = vpop.eup %1225  ;;  %v510_v49 = vmax.f32 %v502_v42, 0.0  ;;  %v527_v50 = vsel %vm275_vm1, %v1220_v36, %v1224_v44  ;;  %v552_v39 = vmul.f32 %v528_v47, %v1774_v33  ;;  %v536_v54 = vmul.f32 %v528_v47, %v1771_v31 }
 0x1c7   : > { %v1228_v51 = vpop.eup %1227  ;;  %v509_v52 = vmax.f32 %v501_v46, 0.0  ;;  %v551_v53 = vmul.f32 %v527_v50, %v1750_v18  ;;  %v535_v0 = vmul.f32 %v527_v50, %v1747_v15  ;;  %1241 = vrsqrt.f32 %v486_v41 }
 0x1c8   : > { %v1230_v55 = vpop.eup %1229  ;;  %v518_v58 = vadd.f32 1e-05, %v510_v49  ;;  %1243 = vrsqrt.f32 %v485_v45 }
 0x1c9   : > { %v1232_v62 = vpop.eup %1231  ;;  %v517_v13 = vadd.f32 1e-05, %v509_v52  ;;  %v530_v16 = vsel %vm275_vm1, %v1226_v48, %v1230_v55  ;;  %v1032_v63 = vpack.c.bf16 %v552_v39, %v551_v53  ;;  %v1044_v5 = vpack.c.bf16 %v536_v54, %v535_v0 }
 0x1ca   : > { %1245 = vrsqrt.f32 %v518_v58  ;;  %v529_v33 = vsel %vm275_vm1, %v1228_v51, %v1232_v62  ;;  %v554_v18 = vmul.f32 %v530_v16, %v1768_v28  ;;  %v538_v15 = vmul.f32 %v530_v16, %v1765_v27 }
 0x1cb   : > { %1247 = vrsqrt.f32 %v517_v13  ;;  %v553_v31 = vmul.f32 %v529_v33, %v1744_v10  ;;  %v537_v17 = vmul.f32 %v529_v33, %v1741_v9  ;;  %v615_v20 = vrot.slane %v1032_v63, %v614_v61 }
 0x1cc   : > { %v1234_v14 = vpop.eup %1233  ;;  %v756_v26 = vrot.slane %v1044_v5, %v614_v61 }
 0x1cd   : > { %v1236_v19 = vpop.eup %1235  ;;  %v1033_v11 = vpack.c.bf16 %v554_v18, %v553_v31  ;;  %v1045_v24 = vpack.c.bf16 %v538_v15, %v537_v17 }
 0x1ce   : > { %v1238_v4 = vpop.eup %1237  ;;  %v532_v28 = vsel %vm275_vm1, %v1236_v19, %v1234_v14 }
 0x1cf   : > { %v1240_v29 = vpop.eup %1239  ;;  %v622_v6 = vrot.slane %v1033_v11, %v614_v61  ;;  %v763_v30 = vrot.slane %v1045_v24, %v614_v61  ;;  %v556_v34 = vmul.f32 %v532_v28, %v1796_v57  ;;  %v540_v38 = vmul.f32 %v532_v28, %v1793_v56 }
 0x1d0   : > { %v531_v27 = vsel %vm275_vm1, %v1240_v29, %v1238_v4 }
 0x1d1   : > { %v623_v10 = vcombine.low %v615_v20, %v622_v6  ;;  %v764_v32 = vcombine.low %v756_v26, %v763_v30  ;;  %v1242_v9 = vpop.eup %1241  ;;  %v555_v23 = vmul.f32 %v531_v27, %v1804_v60  ;;  %v539_v37 = vmul.f32 %v531_v27, %v1801_v59 }
 0x1d2   : > { %v1244_v35 = vpop.eup %1243 }
 0x1d3   : > { %1101 = vmatprep.mubr.bf16.mxu1 %v623_v10  ;;  %1121 = vmatprep.mubr.bf16.mxu0 %v764_v32  ;;  %v1034_v60 = vpack.c.bf16 %v556_v34, %v555_v23  ;;  %v1046_v41 = vpack.c.bf16 %v540_v38, %v539_v37 }
 0x1d4   : > { %v1246_v7 = vpop.eup %1245 }
 0x1d5   : > { %v1248_v8 = vpop.eup %1247  ;;  %v534_v36 = vsel %vm275_vm1, %v1242_v9, %v1246_v7  ;;  %v632_v43 = vrot.slane %v1034_v60, %v614_v61  ;;  %v773_v45 = vrot.slane %v1046_v41, %v614_v61 }
 0x1d6   : > { %v533_v2 = vsel %vm275_vm1, %v1244_v35, %v1248_v8  ;;  %v558_v3 = vmul.f32 %v534_v36, %v1821_v22  ;;  %v542_v57 = vmul.f32 %v534_v36, %v1818_v21  ;;  %v1056_v21 = vld [vmem:[%s1957_s3] ss:$0 sm:$0xff] }
 0x1d7   : > { %v557_v40 = vmul.f32 %v533_v2, %v1830_v25  ;;  %v541_v59 = vmul.f32 %v533_v2, %v1827_v12 }
 0x1d9   : > { %v1035_v56 = vpack.c.bf16 %v558_v3, %v557_v40  ;;  %v1047_v42 = vpack.c.bf16 %v542_v57, %v541_v59 }
 0x1db   : > { %v639_v44 = vrot.slane %v1035_v56, %v614_v61  ;;  %v780_v46 = vrot.slane %v1047_v42, %v614_v61 }
 0x1dd   : > { %v640_v47 = vcombine.low %v632_v43, %v639_v44  ;;  %v781_v1 = vcombine.low %v773_v45, %v780_v46 }
 0x1df   : > { %1102 = vmatmul.mubr.bf16.vlgmr.msra.gmra.mrb[0].mxu1 %v640_v47  ;;  %1122 = vmatmul.mubr.bf16.vlgmr.msra.gmra.mrb[0].mxu0 %v781_v1 }
 0x2b2   : > { %v1103_v22 = vpop.f32.mrb[0].mxu1  ;;  %v1123_v48 = vpop.f32.mrb[0].mxu0 }
 0x2b3   : > { %v875_v12 = vadd.f32 %v1123_v48, %v1103_v22  ;;  %v725_v25 = vpop.f32.mrb[1].mxu1  ;;  %v866_v49 = vpop.f32.mrb[1].mxu0 }
 0x2b4   : > { %v867_v50 = vadd.f32 %v866_v49, %v725_v25  ;;  %v1104_v39 = vpop.f32.mrb[2].mxu1  ;;  %v1124_v51 = vpop.f32.mrb[2].mxu0 }
 0x2b5   : > { %v890_v52 = vadd.f32 %v1056_v21, %v875_v12  ;;  %v878_v53 = vadd.f32 %v1124_v51, %v1104_v39  ;;  %v728_v0 = vpop.f32.mrb[3].mxu1  ;;  %v869_v54 = vpop.f32.mrb[3].mxu0 }
 0x2b6   : > { %v888_v55 = vadd.f32 %v1056_v21, %v867_v50  ;;  %v870_v58 = vadd.f32 %v869_v54, %v728_v0 }
 0x2b7   : > { %v898_v61 = vcombine.high %v890_v52, %v890_v52  ;;  %908 = vst [vmem:[%s245_s12 + $0x10] sm:$0xf] %v890_v52  ;;  %v891_v62 = vadd.f32 %v1056_v21, %v878_v53 }
 0x2b8   : > { %v896_v13 = vcombine.high %v888_v55, %v888_v55  ;;  %904 = vst [vmem:[%s245_s12] sm:$0xf] %v888_v55  ;;  %v889_v16 = vadd.f32 %v1056_v21, %v870_v58 }
 0x2b9   : > { %909 = vst [vmem:[%s245_s12 + $0x14] sm:$0xf] %v898_v61  ;;  %v899_v63 = vcombine.high %v891_v62, %v891_v62  ;;  %910 = vst [vmem:[%s245_s12 + $0x18] sm:$0xf] %v891_v62 }
 0x2ba   : > { %905 = vst [vmem:[%s245_s12 + $0x4] sm:$0xf] %v896_v13  ;;  %v897_v33 = vcombine.high %v889_v16, %v889_v16  ;;  %906 = vst [vmem:[%s245_s12 + $0x8] sm:$0xf] %v889_v16 }
 0x2bb   : > { %911 = vst [vmem:[%s245_s12 + $0x1c] sm:$0xf] %v899_v63 }
 0x2bc   : > { %907 = vst [vmem:[%s245_s12 + $0xc] sm:$0xf] %v897_v33 }
 0x2bd   : > { %1348 = shalt.err (!%p1345_p1)
}
 0x2be   : > { %s1349_s10 = scalar_lea.hbm %s1910_s19, 512  ;;  %s1353_s21 = scalar_lea.hbm %s1958_s4, 1024 }
 0x2bf   : > { %p1350_p13 = scmp.ne.s32.totalorder %s1910_s19, %s1349_s10  ;;  %p1354_p4 = scmp.lt.u32.totalorder %s1910_s19, %s1958_s4 }
 0x2c0   : > { %p1355_p5 = scmp.lt.u32.totalorder %s1353_s21, %s1349_s10  ;;  %p1357_p11 = scmp.lt.u32.totalorder %s1349_s10, %s1910_s19 }
 0x2c1   : > { %p1351_p6 = pnand %p1350_p13, %p1972_p0 }
 0x2c2   : > { %p1356_p8 = por %p1355_p5, %p1354_p4 }
 0x2c3   : > { %p1352_p10 = pneg %p1351_p6 }
 0x2c4   : > { %p1358_p2 = por %p1357_p11, %p1356_p8 }
 0x2c6   : > { %p1359_p3 = pnand %p1358_p2, %p1352_p10 }
 0x2c8   : > { %1362 = shalt.err (!%p1359_p3)
}
 0x2c9   : > { %s1414_s12 = smov 64   ;;  %s1415_s6 = smov 4  }
 0x2ca   : > { %1139 = dma.vmem_to_hbm [thread:$0]  (%p1972_p0), %s1905_s30, 512, %s1910_s19, %s913_s27, %s1414_s12, %s1414_s12, %s1415_s6  }
 0x2cb PF: > { %s941_s25 = sand.u32 1, %s1393_s15   ;;  %p1973_p7 = scmp.ne.s32.totalorder %s1963_s22, 0 }
 0x2cc   : > { %p1974_p9 = scmp.ge.s32.totalorder %s1405_s18, 2  ;;  %s942_s7 = scalar_lea.sflag [#allocation4], %s941_s25 }
 0x2ce   : > { %p1153_p12 = pnand %p1974_p9, %p1973_p7 }
 0x2d0   : > { %1388 = dma.done.wait (!%p1153_p12), %s942_s7, 512  }
 0x2d1   : > { %1390 = vsyncadd (!%p1153_p12), %s942_s7, 4294966784  ;;  %p18_p1 = scmp.ge.s32.totalorder %s1557_s26, 4   ;;  %s1975_s15 = smov %s1397_s16 }
 0x2d2   : > { %s1976_s16 = smov %s1401_s17  ;;  %s1977_s17 = smov %s1573_s14 }
 0x2d3   : > { %s1978_s18 = smov %s1557_s26  ;;  %20 = sbr.rel (!%p18_p1) target bundleno = 6 (0x6), region = 89 }
 0x2da   :  { %947 = vsyncpa [#allocation3], 1 }
 0x2db   :  { %949 = vsyncpa [#allocation3 + $0x1], 1 }
 0x2dc   :  { %950 = vsyncpa [#allocation6], 1 }
 0x2dd   :  { %951 = vsyncpa [#allocation4], 1 }
 0x2de   :  { %953 = vsyncpa [#allocation4 + $0x1], 1 }

</bundles_post_ra>
